<compile_context>
chip_gen: v7x
topology: tpu7x:2x2x1
jax: 0.10.0
libtpu: 0.0.40
codegen_flags: <defaults>
</compile_context>

<pallas_src>
import functools

import jax
import jax.numpy as jnp
from jax.experimental import pallas as pl
from jax.experimental.pallas import tpu as pltpu

_NEG_BIG = -1e30


def _contrastive_kernel(*refs, margin, max_violation, pad_rows):
    """One (t, t) tile of the pairwise hinge-cost matrices.

    Grid: (row blocks of im [parallel, outer], row blocks of s [arbitrary, inner]).
    Outputs are per-row-block partials (lane-dense), combined in the wrapper.
    """
    if pad_rows:
        im_ref, s_ref, d1_ref, d2_ref, rb_ref, cb_ref = refs[:6]
        rest = refs[6:]
    else:
        im_ref, s_ref, d1_ref, d2_ref = refs[:4]
        rb_ref = cb_ref = None
        rest = refs[4:]
    if max_violation:
        loss_ref, colmax_ref, rowmax_sc = rest
    else:
        (loss_ref,) = rest

    ib = pl.program_id(0)            # row block of scores (rows of im)   - outer
    jb = pl.program_id(1)            # column block of scores (rows of s) - inner
    n_jb = pl.num_programs(1)

    # ---- scores tile on the MXU (contract last dims; no transposed copy) ----
    scores = jax.lax.dot_general(
        im_ref[...], s_ref[...],
        dimension_numbers=(((1,), (1,)), ((), ())),
        preferred_element_type=jnp.float32)                    # (t, t) f32

    # Padded rows / columns carry a -1e30 bias so every hinge they touch
    # clamps to exactly 0 (only emitted when padding exists - static flag).
    if pad_rows:
        scores = scores + (rb_ref[...] + cb_ref[...])

    if max_violation:
        # Exact diagonal exclusion (required for the per-row/per-col max):
        # one select on `scores` masks BOTH hinges at once.  Only diagonal
        # blocks (ib == jb) can contain diagonal elements.
        r = jax.lax.broadcasted_iota(jnp.int32, scores.shape, 0)
        c = jax.lax.broadcasted_iota(jnp.int32, scores.shape, 1)
        on_diag = jnp.logical_and(r == c, ib == jb)
        scores = jnp.where(on_diag, _NEG_BIG, scores)
    # For VSE0 the diagonal is NOT masked in-kernel; its exact contribution
    # 2*N*max(margin, 0) is subtracted once in the wrapper.

    if margin != 0.0:                # static Python float
        scores = scores + margin

    d1 = d1_ref[...]                 # (t, 1) diag[row]
    d2 = d2_ref[...]                 # (1, t) diag[col]
    cost_s = jnp.maximum(scores - d1, 0.0)     # caption-retrieval hinge
    cost_im = jnp.maximum(scores - d2, 0.0)    # image-retrieval hinge

    if max_violation:
        # VSE++: hardest negatives.
        @pl.when(jb == 0)
        def _init():
            rowmax_sc[...] = jnp.zeros_like(rowmax_sc)
            loss_ref[...] = jnp.zeros_like(loss_ref)

        rowmax_sc[...] = jnp.maximum(
            rowmax_sc[...], jnp.max(cost_s, axis=1, keepdims=True))
        # Per-(ib, jb) column max, written as a lane-dense (1, t) output block.
        colmax_ref[0] = jnp.max(cost_im, axis=0, keepdims=True)

        @pl.when(jb == n_jb - 1)
        def _finalize_row_block():
            loss_ref[...] = jnp.zeros_like(loss_ref) + jnp.sum(rowmax_sc[...])
    else:
        # VSE0: plain sum of hinge costs; single fused reduction per tile.
        @pl.when(jb == 0)
        def _init():
            loss_ref[...] = jnp.zeros_like(loss_ref)

        loss_ref[...] += jnp.sum(cost_s + cost_im)


def _round_up(x, m):
    return -(-x // m) * m


def _vmem_budget_bytes():
    cap = 64 * 1024 * 1024
    try:
        info = pltpu.get_tpu_info()
        cap = int(getattr(info, "vmem_capacity_bytes", cap)) or cap
    except Exception:
        pass
    return min((cap * 3) // 4, 100 * 1024 * 1024)


def _pick_tile(n_pad, d, itemsize, budget):
    """Largest MXU-aligned tile dividing n_pad whose working set fits the budget."""
    d_eff = _round_up(max(d, 1), 128)            # VMEM lane layout of the (t, d) blocks
    for t in (1024, 512, 256, 128):
        if n_pad % t:
            continue
        need = (4 * t * d_eff * itemsize         # im + s blocks, double-buffered
                + 8 * t * t * 4                  # f32 score / cost intermediates
                + 6 * t * 128 * 4                # (t,1) diag/bias blocks + row-max scratch
                + 2 * 1024 * 1024)               # slack: (1,t) blocks, outputs, misc
        if need <= budget:
            return t
    return 128


def contrastive_loss(im, s, margin=0.0, max_violation=False):
    """JAX/Pallas equivalent of ContrastiveLoss(opt, margin, max_violation)(im, s)."""
    assert im.ndim == 2 and s.ndim == 2 and im.shape == s.shape
    n, d = im.shape
    margin = float(margin)
    max_violation = bool(max_violation)
    itemsize = jnp.dtype(im.dtype).itemsize

    # diag(scores) = rowwise <im_i, s_i>: one O(N*D) pass, no f32 copies of im/s.
    diag = jnp.einsum("nd,nd->n", im, s, preferred_element_type=jnp.float32)

    budget = _vmem_budget_bytes()
    n_pad = _round_up(n, 128)
    t = _pick_tile(n_pad, d, itemsize, budget)
    nb = n_pad // t
    pad_rows = n_pad != n

    if pad_rows:
        im_w = jnp.zeros((n_pad, d), im.dtype).at[:n, :].set(im)
        s_w = jnp.zeros((n_pad, d), s.dtype).at[:n, :].set(s)
        diag_p = jnp.zeros((n_pad,), jnp.float32).at[:n].set(diag)
        bias = jnp.where(jnp.arange(n_pad) < n, 0.0, _NEG_BIG).astype(jnp.float32)
    else:
        im_w, s_w, diag_p = im, s, diag
        bias = None
    # TODO(synk): optionally pad D to a multiple of 128 in HBM; Mosaic already
    #             pads the VMEM layout so this only trades HBM bytes for
    #             slightly cleaner DMAs, and is not done here.

    diag_col = diag_p.reshape(n_pad, 1)
    diag_row = diag_p.reshape(1, n_pad)

    kernel = functools.partial(_contrastive_kernel, margin=margin,
                               max_violation=max_violation, pad_rows=pad_rows)

    in_specs = [
        pl.BlockSpec((t, d), lambda ib, jb: (ib, 0)),    # im rows (re-fetched nb times)
        pl.BlockSpec((t, d), lambda ib, jb: (jb, 0)),    # s rows (streamed per step)
        pl.BlockSpec((t, 1), lambda ib, jb: (ib, 0)),    # diag as column
        pl.BlockSpec((1, t), lambda ib, jb: (0, jb)),    # diag as row
    ]
    args = [im_w, s_w, diag_col, diag_row]
    if pad_rows:
        in_specs += [
            pl.BlockSpec((t, 1), lambda ib, jb: (ib, 0)),  # row validity bias
            pl.BlockSpec((1, t), lambda ib, jb: (0, jb)),  # col validity bias
        ]
        args += [bias.reshape(n_pad, 1), bias.reshape(1, n_pad)]

    loss_shape = jax.ShapeDtypeStruct((nb, 1, 1), jnp.float32)
    loss_spec = pl.BlockSpec((1, 1, 1), lambda ib, jb: (ib, 0, 0))
    if max_violation:
        out_shape = (loss_shape, jax.ShapeDtypeStruct((nb, 1, n_pad), jnp.float32))
        out_specs = [loss_spec,
                     pl.BlockSpec((1, 1, t), lambda ib, jb: (ib, 0, jb))]
        scratch_shapes = [pltpu.VMEM((t, 1), jnp.float32)]  # per-row running max
    else:
        out_shape = loss_shape
        out_specs = loss_spec
        scratch_shapes = []

    flops = 2 * n_pad * n_pad * d
    bytes_accessed = ((nb + 1) * n_pad * d * itemsize
                      + 4 * n_pad * 4
                      + nb * (1 + (n_pad if max_violation else 0)) * 4)

    out = pl.pallas_call(
        kernel,
        out_shape=out_shape,
        grid_spec=pltpu.PrefetchScalarGridSpec(
            num_scalar_prefetch=0,
            grid=(nb, nb),      # (row blocks [parallel], column blocks [arbitrary])
            in_specs=in_specs,
            out_specs=out_specs,
            scratch_shapes=scratch_shapes,
        ),
        compiler_params=pltpu.CompilerParams(
            dimension_semantics=("parallel", "arbitrary"),
            vmem_limit_bytes=int(budget),
        ),
        cost_estimate=pl.CostEstimate(flops=int(flops), transcendentals=0,
                                      bytes_accessed=int(bytes_accessed)),
    )(*args)

    if max_violation:
        part_loss, part_colmax = out
        col_max = jnp.max(part_colmax[:, 0, :], axis=0)      # max over row blocks
        return jnp.sum(part_loss) + jnp.sum(col_max)
    # VSE0: the unmasked diagonal contributed exactly max(margin, 0) to each of
    # cost_s and cost_im for the N valid rows; subtract it analytically.
    return jnp.sum(out) - 2.0 * n * max(margin, 0.0)


def _reference_loss(im, s, margin=0.0, max_violation=False):
    # pure-JAX reference mirroring the PyTorch forward
    scores = im.astype(jnp.float32) @ s.astype(jnp.float32).T
    diag = jnp.diag(scores).reshape(-1, 1)
    cost_s = jnp.maximum(margin + scores - diag, 0.0)
    cost_im = jnp.maximum(margin + scores - diag.T, 0.0)
    eye = jnp.eye(scores.shape[0], dtype=bool)
    cost_s = jnp.where(eye, 0.0, cost_s)
    cost_im = jnp.where(eye, 0.0, cost_im)
    if max_violation:
        cost_s = cost_s.max(axis=1)
        cost_im = cost_im.max(axis=0)
    return cost_s.sum() + cost_im.sum()


if __name__ == "__main__":
    key = jax.random.PRNGKey(0)
    ok = True
    # (16, 32):   single padded block (n -> 128)
    # (300, 48):  padded + multi-block grid (n -> 384, t = 128)
    # (384, 64):  aligned n, multi-block grid, no padding path
    for n, d in [(16, 32), (300, 48), (384, 64)]:
        k1, k2 = jax.random.split(jax.random.fold_in(key, n * 1000 + d))
        im = jax.random.normal(k1, (n, d), dtype=jnp.float32)
        s = jax.random.normal(k2, (n, d), dtype=jnp.float32)
        for margin, max_violation in [(0.0, False), (0.2, False), (0.2, True)]:
            out = jax.block_until_ready(
                contrastive_loss(im, s, margin=margin, max_violation=max_violation))
            ref = _reference_loss(im, s, margin=margin, max_violation=max_violation)
            if not jnp.allclose(out, ref, rtol=1e-3, atol=1e-2):
                ok = False
                print("MISMATCH", n, d, margin, max_violation, float(out), float(ref))
    if ok:
        print("KERNEL_OK")
</pallas_src>

<mosaic_0001>
module attributes {stable_mosaic.version = 11 : i64} {
  func.func @_contrastive_kernel(%arg0: i32, %arg1: i32, %arg2: memref<128x32xf32, #tpu.memory_space<vmem>>, %arg3: memref<128x32xf32, #tpu.memory_space<vmem>>, %arg4: memref<128x1xf32, #tpu.memory_space<vmem>>, %arg5: memref<1x128xf32, #tpu.memory_space<vmem>>, %arg6: memref<128x1xf32, #tpu.memory_space<vmem>>, %arg7: memref<1x128xf32, #tpu.memory_space<vmem>>, %arg8: memref<1x1x1xf32, #tpu.memory_space<vmem>>) attributes {dimension_semantics = [#tpu.dimension_semantics<parallel>, #tpu.dimension_semantics<arbitrary>], iteration_bounds = array<i64: 1, 1>, scalar_prefetch = 0 : i64, scratch_operands = 0 : i64, tpu.core_type = #tpu.core_type<tc>, window_params = [{transform_indices = @transform_0, window_bounds = array<i64: 128, 32>}, {transform_indices = @transform_1, window_bounds = array<i64: 128, 32>}, {transform_indices = @transform_2, window_bounds = array<i64: 128, 1>}, {transform_indices = @transform_3, window_bounds = array<i64: 1, 128>}, {transform_indices = @transform_4, window_bounds = array<i64: 128, 1>}, {transform_indices = @transform_5, window_bounds = array<i64: 1, 128>}, {transform_indices = @transform_6, window_bounds = array<i64: 1, 1, 1>}]} {
    %c0 = arith.constant 0 : index
    %c0_0 = arith.constant 0 : index
    %0 = vector.load %arg2[%c0, %c0_0] : memref<128x32xf32, #tpu.memory_space<vmem>>, vector<128x32xf32>
    %c0_1 = arith.constant 0 : index
    %c0_2 = arith.constant 0 : index
    %1 = vector.load %arg3[%c0_1, %c0_2] : memref<128x32xf32, #tpu.memory_space<vmem>>, vector<128x32xf32>
    %cst = arith.constant dense<0.000000e+00> : vector<128x128xf32>
    %2 = tpu.matmul %0, %1, %cst {dimension_numbers = #tpu.dot_dimension_numbers<[1], [1], [0], [0], [0, 0, 1, 0], [], []>} : vector<128x32xf32>, vector<128x32xf32>, vector<128x128xf32> -> vector<128x128xf32>
    %c0_3 = arith.constant 0 : index
    %c0_4 = arith.constant 0 : index
    %3 = vector.load %arg6[%c0_3, %c0_4] : memref<128x1xf32, #tpu.memory_space<vmem>>, vector<128x1xf32>
    %c0_5 = arith.constant 0 : index
    %c0_6 = arith.constant 0 : index
    %4 = vector.load %arg7[%c0_5, %c0_6] : memref<1x128xf32, #tpu.memory_space<vmem>>, vector<1x128xf32>
    %5 = vector.broadcast %3 : vector<128x1xf32> to vector<128x128xf32>
    %6 = vector.broadcast %4 : vector<1x128xf32> to vector<128x128xf32>
    %7 = arith.addf %5, %6 : vector<128x128xf32>
    %8 = arith.addf %2, %7 : vector<128x128xf32>
    %c0_7 = arith.constant 0 : index
    %c0_8 = arith.constant 0 : index
    %9 = vector.load %arg4[%c0_7, %c0_8] : memref<128x1xf32, #tpu.memory_space<vmem>>, vector<128x1xf32>
    %c0_9 = arith.constant 0 : index
    %c0_10 = arith.constant 0 : index
    %10 = vector.load %arg5[%c0_9, %c0_10] : memref<1x128xf32, #tpu.memory_space<vmem>>, vector<1x128xf32>
    %11 = vector.broadcast %9 : vector<128x1xf32> to vector<128x128xf32>
    %12 = arith.subf %8, %11 : vector<128x128xf32>
    %cst_11 = arith.constant 0.000000e+00 : f32
    %13 = vector.broadcast %cst_11 : f32 to vector<128x128xf32>
    %14 = arith.maximumf %12, %13 : vector<128x128xf32>
    %15 = vector.broadcast %10 : vector<1x128xf32> to vector<128x128xf32>
    %16 = arith.subf %8, %15 : vector<128x128xf32>
    %cst_12 = arith.constant 0.000000e+00 : f32
    %17 = vector.broadcast %cst_12 : f32 to vector<128x128xf32>
    %18 = arith.maximumf %16, %17 : vector<128x128xf32>
    %c0_i32 = arith.constant 0 : i32
    %19 = arith.cmpi eq, %arg1, %c0_i32 : i32
    %20 = arith.extui %19 : i1 to i32
    %c0_i32_13 = arith.constant 0 : i32
    %21 = arith.cmpi ne, %20, %c0_i32_13 : i32
    scf.if %21 {
      %cst_21 = arith.constant 0.000000e+00 : f32
      %31 = vector.broadcast %cst_21 : f32 to vector<1x1x1xf32>
      %c0_22 = arith.constant 0 : index
      %c0_23 = arith.constant 0 : index
      %c0_24 = arith.constant 0 : index
      %32 = vector.load %arg8[%c0_22, %c0_23, %c0_24] : memref<1x1x1xf32, #tpu.memory_space<vmem>>, vector<1x1x1xf32>
      tpu.vector_store %arg8[%c0_22, %c0_23, %c0_24], %31 {strides = array<i32>} : memref<1x1x1xf32, #tpu.memory_space<vmem>>, vector<1x1x1xf32>,
    } else {
    }
    %c0_14 = arith.constant 0 : index
    %c0_15 = arith.constant 0 : index
    %c0_16 = arith.constant 0 : index
    %22 = vector.load %arg8[%c0_14, %c0_15, %c0_16] : memref<1x1x1xf32, #tpu.memory_space<vmem>>, vector<1x1x1xf32>
    %23 = arith.addf %14, %18 : vector<128x128xf32>
    %24 = vector.shape_cast %23 : vector<128x128xf32> to vector<1x128x128xf32>
    %cst_17 = arith.constant dense<0.000000e+00> : vector<1xf32>
    %25 = vector.multi_reduction <add>, %24, %cst_17 [1, 2] : vector<1x128x128xf32> to vector<1xf32>
    %26 = vector.shape_cast %25 : vector<1xf32> to vector<1x1x1xf32>
    %27 = vector.extract %26[0, 0, 0] : f32 from vector<1x1x1xf32>
    %28 = vector.broadcast %27 : f32 to vector<1x1x1xf32>
    %29 = arith.addf %22, %28 : vector<1x1x1xf32>
    %c0_18 = arith.constant 0 : index
    %c0_19 = arith.constant 0 : index
    %c0_20 = arith.constant 0 : index
    %30 = vector.load %arg8[%c0_18, %c0_19, %c0_20] : memref<1x1x1xf32, #tpu.memory_space<vmem>>, vector<1x1x1xf32>
    tpu.vector_store %arg8[%c0_18, %c0_19, %c0_20], %29 {strides = array<i32>} : memref<1x1x1xf32, #tpu.memory_space<vmem>>, vector<1x1x1xf32>,
    return
  }
  func.func @transform_0(%arg0: i32, %arg1: i32) -> (i32, i32) {
    %c0_i32 = arith.constant 0 : i32
    %c0_i32_0 = arith.constant 0 : i32
    return %arg0, %c0_i32 : i32, i32
  }
  func.func @transform_1(%arg0: i32, %arg1: i32) -> (i32, i32) {
    %c0_i32 = arith.constant 0 : i32
    %c0_i32_0 = arith.constant 0 : i32
    return %arg1, %c0_i32 : i32, i32
  }
  func.func @transform_2(%arg0: i32, %arg1: i32) -> (i32, i32) {
    %c0_i32 = arith.constant 0 : i32
    %c0_i32_0 = arith.constant 0 : i32
    return %arg0, %c0_i32 : i32, i32
  }
  func.func @transform_3(%arg0: i32, %arg1: i32) -> (i32, i32) {
    %c0_i32 = arith.constant 0 : i32
    %c0_i32_0 = arith.constant 0 : i32
    return %c0_i32, %arg1 : i32, i32
  }
  func.func @transform_4(%arg0: i32, %arg1: i32) -> (i32, i32) {
    %c0_i32 = arith.constant 0 : i32
    %c0_i32_0 = arith.constant 0 : i32
    return %arg0, %c0_i32 : i32, i32
  }
  func.func @transform_5(%arg0: i32, %arg1: i32) -> (i32, i32) {
    %c0_i32 = arith.constant 0 : i32
    %c0_i32_0 = arith.constant 0 : i32
    return %c0_i32, %arg1 : i32, i32
  }
  func.func @transform_6(%arg0: i32, %arg1: i32) -> (i32, i32, i32) {
    %c0_i32 = arith.constant 0 : i32
    %c0_i32_0 = arith.constant 0 : i32
    %c0_i32_1 = arith.constant 0 : i32
    return %arg0, %c0_i32, %c0_i32_0 : i32, i32, i32
  }
}

</mosaic_0001>

<bundles_post_ra>
// kernel: tpu_custom_call.1
= control target key start
LH: loop header
LB: loop body
LE: loop exit
PB: predicated region body
PF: predicated region fallthrough
CT: control target
= control target key end

     0   :  { %vm175_vm0 = vcmask 261120   ;;  %v866_v6 = vmov 0   ;;  %s1298_s0 = inlined_call_operand.vmem [shape: f32[128,32], index: 0, kind: input, shape index: {}]   ;;  %s1299_s1 = inlined_call_operand.vmem [shape: f32[128,32], index: 1, kind: input, shape index: {}]   ;;  %s1300_s2 = inlined_call_operand.vmem [shape: f32[128,1], index: 2, kind: input, shape index: {}]   ;;  %s1301_s3 = inlined_call_operand.vmem [shape: f32[1,128], index: 3, kind: input, shape index: {}]   ;;  %s1302_s4 = inlined_call_operand.vmem [shape: f32[128,1], index: 4, kind: input, shape index: {}]   ;;  %s1303_s5 = inlined_call_operand.vmem [shape: f32[1,128], index: 5, kind: input, shape index: {}]   ;;  %s1304_s6 = inlined_call_operand.hbm [shape: f32[1,1,1], index: 6, kind: output, shape index: {}]  }
   0x1   :  { %v40_v0 = vld [vmem:[%s1299_s1] sm:$0xff]  ;;  %v41_v1 = vld [vmem:[%s1299_s1 + $0x8] sm:$0xff]  ;;  %v42_v2 = vld [vmem:[%s1299_s1 + $0x10] sm:$0xff]  ;;  %840 = vset.pattern.permute.xlu0 %v866_v6  ;;  %841 = vset.pattern.permute.xlu1 %v866_v6 }
   0x2   :  { %v771_v3 = vpack.c.bf16 %v41_v1, %v40_v0  ;;  %vm915_vm1 = vmpackc.low %vm175_vm0, %vm175_vm0  ;;  %v43_v5 = vld [vmem:[%s1299_s1 + $0x18] sm:$0xff]  ;;  %v44_v8 = vld [vmem:[%s1299_s1 + $0x20] sm:$0xff] }
   0x3   :  { %v777_v7 = vpack.c.bf16 %v43_v5, %v42_v2  ;;  %v56_v9 = vld [vmem:[%s1302_s4] sm:$0xff]  ;;  %v45_v10 = vld [vmem:[%s1299_s1 + $0x28] sm:$0xff]  ;;  %v58_v11 = vld [vmem:[%s1302_s4 + $0x10] sm:$0xff] }
   0x4   :  { %773 = vmatprep.subr.msk.bf16.mxu0 %vm915_vm1, %v771_v3  ;;  %819 = vmatprep.subr.msk.bf16.mxu1 %vm915_vm1, %v771_v3  ;;  %v24_v12 = vld [vmem:[%s1298_s0] sm:$0xff]  ;;  %v57_v13 = vld [vmem:[%s1302_s4 + $0x8] sm:$0xff]  ;;  %v59_v15 = vld [vmem:[%s1302_s4 + $0x18] sm:$0xff]  ;;  %v783_v16 = vpack.c.bf16 %v45_v10, %v44_v8 }
   0x5   :  { %776 = vmatpush3.bf16.xpose.msk.msra.mxu0 %vm915_vm1, %v771_v3  ;;  %827 = vmatpush3.bf16.xpose.msk.msra.mxu1 %vm915_vm1, %v771_v3  ;;  %v32_v14 = vld [vmem:[%s1298_s0 + $0x40] sm:$0xff]  ;;  %v418_v18 = vld [vmem:[%s1300_s2 + $0x8] sm:$0xff]  ;;  %v46_v19 = vld [vmem:[%s1299_s1 + $0x30] sm:$0xff] }
   0x6   :  { %779 = vmatprep.subr.msk.bf16.mxu0 %vm915_vm1, %v777_v7  ;;  %820 = vmatprep.subr.msk.bf16.mxu1 %vm915_vm1, %v777_v7  ;;  %v417_v17 = vld [vmem:[%s1300_s2] sm:$0xff]  ;;  %v47_v20 = vld [vmem:[%s1299_s1 + $0x38] sm:$0xff]  ;;  %v419_v22 = vld [vmem:[%s1300_s2 + $0x10] sm:$0xff] }
   0x7   :  { %75 = vperm.xlu0 %840, %v56_v9   ;;  %85 = vperm.xlu1 %841, %v58_v11   ;;  %v60_v21 = vld [vmem:[%s1302_s4 + $0x20] sm:$0xff]  ;;  %v789_v23 = vpack.c.bf16 %v47_v20, %v46_v19  ;;  %v61_v24 = vld [vmem:[%s1302_s4 + $0x28] sm:$0xff]  ;;  %v420_v25 = vld [vmem:[%s1300_s2 + $0x18] sm:$0xff] }
   0x8   :  { %747 = vmatprep.mubr.msk.f32.mxu0 %vm175_vm0, %v24_v12  ;;  %759 = vmatprep.mubr.msk.f32.mxu1 %vm175_vm0, %v32_v14  ;;  %v48_v26 = vld [vmem:[%s1299_s1 + $0x40] sm:$0xff]  ;;  %v49_v27 = vld [vmem:[%s1299_s1 + $0x48] sm:$0xff] }
   0xb   :  { %80 = vperm.xlu0 %840, %v57_v13   ;;  %90 = vperm.xlu1 %841, %v59_v15  }
   0xd   :  { %782 = vmatpush3.bf16.xpose.msk.msra.mxu0 %vm915_vm1, %v777_v7  ;;  %828 = vmatpush3.bf16.xpose.msk.msra.mxu1 %vm915_vm1, %v777_v7 }
   0xe   :  { %785 = vmatprep.subr.msk.bf16.mxu0 %vm915_vm1, %v783_v16  ;;  %821 = vmatprep.subr.msk.bf16.mxu1 %vm915_vm1, %v783_v16 }
   0xf   :  { %436 = vperm.xlu0 %840, %v417_v17   ;;  %441 = vperm.xlu1 %841, %v418_v18  }
  0x13   :  { %95 = vperm.xlu0 %840, %v60_v21   ;;  %446 = vperm.xlu1 %841, %v419_v22  }
  0x15   :  { %788 = vmatpush3.bf16.xpose.msk.msra.mxu0 %vm915_vm1, %v783_v16  ;;  %829 = vmatpush3.bf16.xpose.msk.msra.mxu1 %vm915_vm1, %v783_v16 }
  0x16   :  { %791 = vmatprep.subr.msk.bf16.mxu0 %vm915_vm1, %v789_v23  ;;  %822 = vmatprep.subr.msk.bf16.mxu1 %vm915_vm1, %v789_v23 }
  0x17   :  { %100 = vperm.xlu0 %840, %v61_v24  }
  0x18   :  { %11 = vsyncpa [#allocation3], 0  ;;  %451 = vperm.xlu1 %841, %v420_v25   ;;  %v62_v28 = vld [vmem:[%s1302_s4 + $0x30] sm:$0xff]  ;;  %v421_v29 = vld [vmem:[%s1300_s2 + $0x20] sm:$0xff]  ;;  %v795_v30 = vpack.c.bf16 %v49_v27, %v48_v26  ;;  %vm588_vm2 = vcmask 0  }
  0x19   :  { %v63_v31 = vld [vmem:[%s1302_s4 + $0x38] sm:$0xff]  ;;  %v422_v32 = vld [vmem:[%s1300_s2 + $0x28] sm:$0xff]  ;;  %v50_v33 = vld [vmem:[%s1299_s1 + $0x50] sm:$0xff] }
  0x1a   :  { %v51_v34 = vld [vmem:[%s1299_s1 + $0x58] sm:$0xff]  ;;  %v64_v35 = vld [vmem:[%s1302_s4 + $0x40] sm:$0xff]  ;;  %v423_v36 = vld [vmem:[%s1300_s2 + $0x30] sm:$0xff] }
  0x1b   :  { %105 = vperm.xlu0 %840, %v62_v28   ;;  %v801_v37 = vpack.c.bf16 %v51_v34, %v50_v33  ;;  %v65_v38 = vld [vmem:[%s1302_s4 + $0x48] sm:$0xff]  ;;  %v424_v39 = vld [vmem:[%s1300_s2 + $0x38] sm:$0xff]  ;;  %v52_v40 = vld [vmem:[%s1299_s1 + $0x60] sm:$0xff] }
  0x1c   :  { %456 = vperm.xlu1 %841, %v421_v29   ;;  %v53_v41 = vld [vmem:[%s1299_s1 + $0x68] sm:$0xff]  ;;  %v66_v42 = vld [vmem:[%s1302_s4 + $0x50] sm:$0xff]  ;;  %v425_v43 = vld [vmem:[%s1300_s2 + $0x40] sm:$0xff] }
  0x1d   :  { %794 = vmatpush3.bf16.xpose.msk.msra.mxu0 %vm915_vm1, %v789_v23  ;;  %830 = vmatpush3.bf16.xpose.msk.msra.mxu1 %vm915_vm1, %v789_v23  ;;  %v807_v44 = vpack.c.bf16 %v53_v41, %v52_v40  ;;  %v67_v45 = vld [vmem:[%s1302_s4 + $0x58] sm:$0xff]  ;;  %v426_v46 = vld [vmem:[%s1300_s2 + $0x48] sm:$0xff]  ;;  %v54_v47 = vld [vmem:[%s1299_s1 + $0x70] sm:$0xff] }
  0x1e   :  { %797 = vmatprep.subr.msk.bf16.mxu0 %vm915_vm1, %v795_v30  ;;  %823 = vmatprep.subr.msk.bf16.mxu1 %vm915_vm1, %v795_v30  ;;  %v55_v48 = vld [vmem:[%s1299_s1 + $0x78] sm:$0xff]  ;;  %v68_v49 = vld [vmem:[%s1302_s4 + $0x60] sm:$0xff]  ;;  %v427_v50 = vld [vmem:[%s1300_s2 + $0x50] sm:$0xff] }
  0x1f   :  { %110 = vperm.xlu0 %840, %v63_v31   ;;  %v813_v51 = vpack.c.bf16 %v55_v48, %v54_v47  ;;  %v69_v52 = vld [vmem:[%s1302_s4 + $0x68] sm:$0xff]  ;;  %v428_v53 = vld [vmem:[%s1300_s2 + $0x58] sm:$0xff]  ;;  %v70_v54 = vld [vmem:[%s1302_s4 + $0x70] sm:$0xff] }
  0x20   :  { %461 = vperm.xlu1 %841, %v422_v32   ;;  %v429_v55 = vld [vmem:[%s1300_s2 + $0x60] sm:$0xff]  ;;  %v71_v56 = vld [vmem:[%s1302_s4 + $0x78] sm:$0xff]  ;;  %v430_v57 = vld [vmem:[%s1300_s2 + $0x68] sm:$0xff] }
  0x21   :  { %v431_v58 = vld [vmem:[%s1300_s2 + $0x70] sm:$0xff]  ;;  %v25_v59 = vld [vmem:[%s1298_s0 + $0x8] sm:$0xff]  ;;  %v432_v63 = vld [vmem:[%s1300_s2 + $0x78] sm:$0xff] }
  0x22   :  { %v33_v60 = vld [vmem:[%s1298_s0 + $0x48] sm:$0xff]  ;;  %v26_v61 = vld [vmem:[%s1298_s0 + $0x10] sm:$0xff]  ;;  %v27_v0 = vld [vmem:[%s1298_s0 + $0x18] sm:$0xff] }
  0x23   :  { %115 = vperm.xlu0 %840, %v64_v35   ;;  %v34_v62 = vld [vmem:[%s1298_s0 + $0x50] sm:$0xff]  ;;  %v35_v1 = vld [vmem:[%s1298_s0 + $0x58] sm:$0xff]  ;;  %v28_v2 = vld [vmem:[%s1298_s0 + $0x20] sm:$0xff] }
  0x24   :  { %466 = vperm.xlu1 %841, %v423_v36   ;;  %v36_v3 = vld [vmem:[%s1298_s0 + $0x60] sm:$0xff]  ;;  %v29_v4 = vld [vmem:[%s1298_s0 + $0x28] sm:$0xff]  ;;  %v30_v6 = vld [vmem:[%s1298_s0 + $0x30] sm:$0xff] }
  0x25   :  { %800 = vmatpush3.bf16.xpose.msk.msra.mxu0 %vm915_vm1, %v795_v30  ;;  %831 = vmatpush3.bf16.xpose.msk.msra.mxu1 %vm915_vm1, %v795_v30  ;;  %v37_v5 = vld [vmem:[%s1298_s0 + $0x68] sm:$0xff]  ;;  %v38_v7 = vld [vmem:[%s1298_s0 + $0x70] sm:$0xff]  ;;  %v31_v8 = vld [vmem:[%s1298_s0 + $0x38] sm:$0xff] }
  0x26   :  { %803 = vmatprep.subr.msk.bf16.mxu0 %vm915_vm1, %v801_v37  ;;  %824 = vmatprep.subr.msk.bf16.mxu1 %vm915_vm1, %v801_v37  ;;  %v39_v9 = vld [vmem:[%s1298_s0 + $0x78] sm:$0xff]  ;;  %v1201_v28 = vld [vmem:[%s1303_s5] ss:$0 sm:$0xff] }
  0x27   :  { %120 = vperm.xlu0 %840, %v65_v38   ;;  %v1212_v34 = vld [vmem:[%s1301_s3] ss:$0 sm:$0xff]  ;;  %s868_s3 = smov [#allocation2]  }
  0x28   :  { %471 = vperm.xlu1 %841, %v424_v39   ;;  %s641_s5 = sshll.u32 %s868_s3, 4  ;;  %s642_s5 = int_to_ptr.vmem [resolvable:$true] %s641_s5 }
  0x29   :  { %s842_s28 = scalar_lea.vmem %s642_s5, 16  ;;  %s846_s29 = scalar_lea.vmem %s642_s5, 32 }
  0x2a   :  { %p843_p0 = scmp.ne.s32.totalorder %s642_s5, %s842_s28  ;;  %p847_p1 = scmp.lt.s32.totalorder %s642_s5, %s642_s5 }
  0x2b   :  { %125 = vperm.xlu0 %840, %v66_v42   ;;  %p848_p2 = scmp.lt.s32.totalorder %s846_s29, %s842_s28 }
  0x2c   :  { %476 = vperm.xlu1 %841, %v425_v43  }
  0x2d   :  { %806 = vmatpush3.bf16.xpose.msk.msra.mxu0 %vm915_vm1, %v801_v37  ;;  %832 = vmatpush3.bf16.xpose.msk.msra.mxu1 %vm915_vm1, %v801_v37  ;;  %p849_p3 = por %p848_p2, %p847_p1 }
  0x2e   :  { %809 = vmatprep.subr.msk.bf16.mxu0 %vm915_vm1, %v807_v44  ;;  %825 = vmatprep.subr.msk.bf16.mxu1 %vm915_vm1, %v807_v44 }
  0x2f   :  { %130 = vperm.xlu0 %840, %v67_v45   ;;  %p850_p4 = pnand %p849_p3, %p843_p0 }
  0x30   :  { %481 = vperm.xlu1 %841, %v426_v46  }
  0x33   :  { %135 = vperm.xlu0 %840, %v68_v49  }
  0x34   :  { %486 = vperm.xlu1 %841, %v427_v50  }
  0x35   :  { %812 = vmatpush3.bf16.xpose.msk.msra.mxu0 %vm915_vm1, %v807_v44  ;;  %833 = vmatpush3.bf16.xpose.msk.msra.mxu1 %vm915_vm1, %v807_v44 }
  0x36   :  { %815 = vmatprep.subr.msk.bf16.mxu0 %vm915_vm1, %v813_v51  ;;  %826 = vmatprep.subr.msk.bf16.mxu1 %vm915_vm1, %v813_v51 }
  0x37   :  { %140 = vperm.xlu0 %840, %v69_v52  }
  0x38   :  { %491 = vperm.xlu1 %841, %v428_v53  }
  0x3b   :  { %145 = vperm.xlu0 %840, %v70_v54  }
  0x3c   :  { %496 = vperm.xlu1 %841, %v429_v55  }
  0x3d   :  { %818 = vmatpush3.bf16.xpose.msk.msra.mxu0 %vm915_vm1, %v813_v51  ;;  %834 = vmatpush3.bf16.xpose.msk.msra.mxu1 %vm915_vm1, %v813_v51 }
  0x3f   :  { %150 = vperm.xlu0 %840, %v71_v56  }
  0x40   :  { %501 = vperm.xlu1 %841, %v430_v57  }
  0x43   :  { %506 = vperm.xlu0 %840, %v431_v58  }
  0x44   :  { %748 = vmatmul.mubr.msk.f32.vlgmr.msra.gmra.mrb[0].mxu0 %vm175_vm0, %v25_v59  ;;  %760 = vmatmul.mubr.msk.f32.vlgmr.msra.gmra.mrb[0].mxu1 %vm175_vm0, %v33_v60 }
  0x45   :  { %750 = vmatprep.mubr.msk.f32.mxu0 %vm175_vm0, %v26_v61  ;;  %762 = vmatprep.mubr.msk.f32.mxu1 %vm175_vm0, %v34_v62 }
  0x46   :  { %511 = vperm.xlu1 %841, %v432_v63  }
  0x48   :  { %751 = vmatmul.mubr.msk.f32.gmra.mrb[2].mxu0 %vm175_vm0, %v27_v0  ;;  %763 = vmatmul.mubr.msk.f32.gmra.mrb[2].mxu1 %vm175_vm0, %v35_v1 }
  0x49   :  { %753 = vmatprep.mubr.msk.f32.mxu0 %vm175_vm0, %v28_v2  ;;  %765 = vmatprep.mubr.msk.f32.mxu1 %vm175_vm0, %v36_v3 }
  0x4c   :  { %754 = vmatmul.mubr.msk.f32.gmra.mrb[4].mxu0 %vm175_vm0, %v29_v4  ;;  %766 = vmatmul.mubr.msk.f32.gmra.mrb[4].mxu1 %vm175_vm0, %v37_v5 }
  0x4d   :  { %756 = vmatprep.mubr.msk.f32.mxu0 %vm175_vm0, %v30_v6  ;;  %768 = vmatprep.mubr.msk.f32.mxu1 %vm175_vm0, %v38_v7 }
  0x50   :  { %757 = vmatmul.mubr.msk.f32.gmra.mrb[6].mxu0 %vm175_vm0, %v31_v8  ;;  %769 = vmatmul.mubr.msk.f32.gmra.mrb[6].mxu1 %vm175_vm0, %v39_v9 }
  0x86   :  { %v76_v10 = vpop.permute.xlu0 %75  ;;  %v86_v11 = vpop.permute.xlu1 %85 }
  0x87   :  { %v159_v32 = vadd.f32 %v1201_v28, %v76_v10  ;;  %v161_v53 = vadd.f32 %v1201_v28, %v86_v11 }
  0x8a   :  { %v81_v12 = vpop.permute.xlu0 %80  ;;  %v91_v13 = vpop.permute.xlu1 %90 }
  0x8b   :  { %v160_v31 = vadd.f32 %v1201_v28, %v81_v12  ;;  %v162_v48 = vadd.f32 %v1201_v28, %v91_v13 }
  0x8e   :  { %v437_v14 = vpop.permute.xlu0 %436  ;;  %v442_v15 = vpop.permute.xlu1 %441 }
  0x92   :  { %v96_v16 = vpop.permute.xlu0 %95  ;;  %v447_v17 = vpop.permute.xlu1 %446 }
  0x93   :  { %v163_v6 = vadd.f32 %v1201_v28, %v96_v16 }
  0x96   :  { %v101_v18 = vpop.permute.xlu0 %100 }
  0x97   :  { %v452_v19 = vpop.permute.xlu1 %451  ;;  %v164_v7 = vadd.f32 %v1201_v28, %v101_v18 }
  0x9a   :  { %v1182_v20 = vpop.permute.xlu0 %105 }
  0x9b   :  { %v1184_v21 = vpop.permute.xlu1 %456  ;;  %v165_v16 = vadd.f32 %v1201_v28, %v1182_v20 }
  0x9e   :  { %v1186_v22 = vpop.permute.xlu0 %110 }
  0x9f   :  { %v1188_v23 = vpop.permute.xlu1 %461 }
  0xa2   :  { %v1190_v24 = vpop.permute.xlu0 %115 }
  0xa3   :  { %v1192_v25 = vpop.permute.xlu1 %466 }
  0xa6   :  { %v1194_v26 = vpop.permute.xlu0 %120 }
  0xa7   :  { %v1196_v27 = vpop.permute.xlu1 %471  ;;  %v168_v20 = vadd.f32 %v1201_v28, %v1194_v26 }
  0xaa   :  { %v1203_v29 = vpop.permute.xlu0 %125 }
  0xab   :  { %v1205_v30 = vpop.permute.xlu1 %476 }
  0xae   :  { %v1218_v40 = vpop.permute.xlu0 %130 }
  0xaf   :  { %v1220_v41 = vpop.permute.xlu1 %481 }
  0xb2   :  { %v136_v2 = vpop.permute.xlu0 %135 }
  0xb3   :  { %v1236_v8 = vpop.permute.xlu1 %486 }
 0x117   :  { %v749_v33 = vpop.f32.mrb[0].mxu0  ;;  %v1214_v35 = vpop.f32.mrb[0].mxu1 }
 0x118   :  { %v344_v36 = vadd.f32 %v749_v33, %v160_v31  ;;  %v338_v37 = vpop.f32.mrb[1].mxu0  ;;  %v1216_v38 = vpop.f32.mrb[1].mxu1 }
 0x119   :  { %v339_v39 = vadd.f32 %v338_v37, %v159_v32 }
 0x11a   :  { %v515_v42 = vsub.f32 %v344_v36, %v442_v15  ;;  %v553_v43 = vsub.f32 %v344_v36, %v1212_v34  ;;  %v141_v36 = vpop.permute.xlu0 %140 }
 0x11b   :  { %v514_v44 = vsub.f32 %v339_v39, %v437_v14  ;;  %v552_v45 = vsub.f32 %v339_v39, %v1212_v34  ;;  %v752_v46 = vpop.f32.mrb[2].mxu0  ;;  %v1224_v47 = vpop.f32.mrb[2].mxu1 }
 0x11c   :  { %v531_v49 = vmax.f32 %v515_v42, 0.0  ;;  %v569_v50 = vmax.f32 %v553_v43, 0.0  ;;  %v348_v51 = vpop.f32.mrb[3].mxu0  ;;  %v388_v52 = vpop.f32.mrb[3].mxu1  ;;  %v354_v57 = vadd.f32 %v752_v46, %v162_v48 }
 0x11d   :  { %v530_v54 = vmax.f32 %v514_v44, 0.0  ;;  %v568_v55 = vmax.f32 %v552_v45, 0.0  ;;  %v349_v59 = vadd.f32 %v348_v51, %v161_v53  ;;  %v166_v44 = vadd.f32 %v1201_v28, %v1186_v22 }
 0x11e   :  { %v592_v56 = vadd.f32 %v569_v50, %v531_v49  ;;  %v517_v62 = vsub.f32 %v354_v57, %v452_v19  ;;  %v555_v63 = vsub.f32 %v354_v57, %v1212_v34  ;;  %v167_v45 = vadd.f32 %v1201_v28, %v1190_v24 }
 0x11f   :  { %v591_v58 = vadd.f32 %v568_v55, %v530_v54  ;;  %v755_v60 = vpop.f32.mrb[4].mxu0  ;;  %v1228_v61 = vpop.f32.mrb[4].mxu1  ;;  %v516_v4 = vsub.f32 %v349_v59, %v447_v17  ;;  %v554_v5 = vsub.f32 %v349_v59, %v1212_v34  ;;  %v169_v54 = vadd.f32 %v1201_v28, %v1203_v29 }
 0x120   :  { %v358_v0 = vpop.f32.mrb[5].mxu0  ;;  %v1231_v1 = vpop.f32.mrb[5].mxu1  ;;  %v533_v9 = vmax.f32 %v517_v62, 0.0  ;;  %v571_v10 = vmax.f32 %v555_v63, 0.0  ;;  %v364_v15 = vadd.f32 %v755_v60, %v164_v7  ;;  %v379_v53 = vadd.f32 %v1216_v38, %v167_v45 }
 0x121   :  { %v607_v3 = vadd.f32 %v592_v56, %v591_v58  ;;  %v532_v11 = vmax.f32 %v516_v4, 0.0  ;;  %v570_v12 = vmax.f32 %v554_v5, 0.0  ;;  %v359_v32 = vadd.f32 %v358_v0, %v163_v6  ;;  %v146_v58 = vpop.permute.xlu0 %145 }
 0x122   :  { %v519_v18 = vsub.f32 %v364_v15, %v1188_v23  ;;  %v557_v33 = vsub.f32 %v364_v15, %v1212_v34  ;;  %v594_v37 = vadd.f32 %v571_v10, %v533_v9  ;;  %v492_v23 = vpop.permute.xlu1 %491  ;;  %v384_v22 = vadd.f32 %v1214_v35, %v168_v20 }
 0x123   :  { %v758_v13 = vpop.f32.mrb[6].mxu0  ;;  %v1238_v14 = vpop.f32.mrb[6].mxu1  ;;  %v593_v17 = vadd.f32 %v570_v12, %v532_v11  ;;  %v518_v42 = vsub.f32 %v359_v32, %v1184_v21  ;;  %v556_v43 = vsub.f32 %v359_v32, %v1212_v34  ;;  %v170_v24 = vadd.f32 %v1201_v28, %v1218_v40 }
 0x124   :  { %v368_v19 = vpop.f32.mrb[7].mxu0  ;;  %v1240_v31 = vpop.f32.mrb[7].mxu1  ;;  %v535_v46 = vmax.f32 %v519_v18, 0.0  ;;  %v573_v48 = vmax.f32 %v557_v33, 0.0  ;;  %v374_v21 = vadd.f32 %v758_v13, %v166_v44  ;;  %v389_v59 = vadd.f32 %v388_v52, %v169_v54 }
 0x125   :  { %v608_v39 = vadd.f32 %v607_v3, %v593_v17  ;;  %v534_v49 = vmax.f32 %v518_v42, 0.0  ;;  %v572_v50 = vmax.f32 %v556_v43, 0.0  ;;  %v369_v56 = vadd.f32 %v368_v19, %v165_v16  ;;  %v151_v13 = vpop.permute.xlu0 %150 }
 0x126   :  { %v521_v26 = vsub.f32 %v374_v21, %v1196_v27  ;;  %v559_v57 = vsub.f32 %v374_v21, %v1212_v34  ;;  %v596_v60 = vadd.f32 %v573_v48, %v535_v46  ;;  %v171_v63 = vadd.f32 %v1201_v28, %v136_v2  ;;  %v497_v3 = vpop.permute.xlu1 %496 }
 0x127   :  { %v609_v51 = vadd.f32 %v608_v39, %v594_v37  ;;  %v595_v55 = vadd.f32 %v572_v50, %v534_v49  ;;  %v520_v38 = vsub.f32 %v369_v56, %v1192_v25  ;;  %v522_v29 = vsub.f32 %v379_v53, %v1205_v30 }
 0x128   :  { %v560_v35 = vsub.f32 %v379_v53, %v1212_v34  ;;  %v558_v0 = vsub.f32 %v369_v56, %v1212_v34  ;;  %v523_v40 = vsub.f32 %v384_v22, %v1220_v41  ;;  %v394_v27 = vadd.f32 %v1224_v47, %v170_v24 }
 0x129   :  { %v610_v62 = vadd.f32 %v609_v51, %v595_v55  ;;  %v536_v4 = vmax.f32 %v520_v38, 0.0  ;;  %v561_v52 = vsub.f32 %v384_v22, %v1212_v34  ;;  %v537_v6 = vmax.f32 %v521_v26, 0.0 }
 0x12a   :  { %v575_v7 = vmax.f32 %v559_v57, 0.0  ;;  %v574_v25 = vmax.f32 %v558_v0, 0.0  ;;  %v172_v2 = vadd.f32 %v1201_v28, %v141_v36  ;;  %v524_v30 = vsub.f32 %v389_v59, %v1236_v8  ;;  %v502_v36 = vpop.permute.xlu1 %501 }
 0x12b   :  { %v611_v5 = vadd.f32 %v610_v62, %v596_v60  ;;  %v562_v9 = vsub.f32 %v389_v59, %v1212_v34  ;;  %v399_v10 = vadd.f32 %v1231_v1, %v171_v63  ;;  %v538_v11 = vmax.f32 %v522_v29, 0.0 }
 0x12c   :  { %v576_v12 = vmax.f32 %v560_v35, 0.0  ;;  %v597_v41 = vadd.f32 %v574_v25, %v536_v4  ;;  %v173_v47 = vadd.f32 %v1201_v28, %v146_v58  ;;  %v525_v15 = vsub.f32 %v394_v27, %v492_v23 }
 0x12d   :  { %v563_v19 = vsub.f32 %v394_v27, %v1212_v34  ;;  %v404_v17 = vadd.f32 %v1228_v61, %v172_v2  ;;  %v539_v32 = vmax.f32 %v523_v40, 0.0  ;;  %v577_v16 = vmax.f32 %v561_v52, 0.0 }
 0x12e   :  { %v598_v18 = vadd.f32 %v575_v7, %v537_v6  ;;  %v612_v33 = vadd.f32 %v611_v5, %v597_v41  ;;  %v174_v8 = vadd.f32 %v1201_v28, %v151_v13  ;;  %v540_v37 = vmax.f32 %v524_v30, 0.0  ;;  %v507_v28 = vpop.permute.xlu0 %506  ;;  %v512_v56 = vpop.permute.xlu1 %511 }
 0x12f   :  { %v578_v1 = vmax.f32 %v562_v9, 0.0  ;;  %v526_v39 = vsub.f32 %v399_v10, %v497_v3  ;;  %v599_v42 = vadd.f32 %v576_v12, %v538_v11  ;;  %v564_v43 = vsub.f32 %v399_v10, %v1212_v34 }
 0x130   :  { %v613_v44 = vadd.f32 %v612_v33, %v598_v18  ;;  %v409_v45 = vadd.f32 %v1240_v31, %v173_v47  ;;  %v541_v20 = vmax.f32 %v525_v15, 0.0  ;;  %v579_v46 = vmax.f32 %v563_v19, 0.0 }
 0x131   :  { %v527_v23 = vsub.f32 %v404_v17, %v502_v36  ;;  %v600_v61 = vadd.f32 %v577_v16, %v539_v32  ;;  %v565_v48 = vsub.f32 %v404_v17, %v1212_v34  ;;  %v414_v49 = vadd.f32 %v1238_v14, %v174_v8 }
 0x132   :  { %v614_v50 = vadd.f32 %v613_v44, %v599_v42  ;;  %v601_v51 = vadd.f32 %v578_v1, %v540_v37  ;;  %v542_v53 = vmax.f32 %v526_v39, 0.0  ;;  %v580_v21 = vmax.f32 %v564_v43, 0.0 }
 0x133   :  { %v528_v22 = vsub.f32 %v409_v45, %v507_v28  ;;  %v566_v55 = vsub.f32 %v409_v45, %v1212_v34  ;;  %v602_v24 = vadd.f32 %v579_v46, %v541_v20  ;;  %v543_v31 = vmax.f32 %v527_v23, 0.0 }
 0x134   :  { %v615_v54 = vadd.f32 %v614_v50, %v600_v61  ;;  %v581_v26 = vmax.f32 %v565_v48, 0.0  ;;  %v529_v57 = vsub.f32 %v414_v49, %v512_v56  ;;  %v567_v58 = vsub.f32 %v414_v49, %v1212_v34 }
 0x135   :  { %v603_v60 = vadd.f32 %v580_v21, %v542_v53  ;;  %v544_v62 = vmax.f32 %v528_v22, 0.0  ;;  %v582_v14 = vmax.f32 %v566_v55, 0.0  ;;  %v867_v52 = vmov 0.0  }
 0x136   :  { %v616_v59 = vadd.f32 %v615_v54, %v601_v51  ;;  %v604_v63 = vadd.f32 %v581_v26, %v543_v31  ;;  %v545_v29 = vmax.f32 %v529_v57, 0.0  ;;  %v583_v35 = vmax.f32 %v567_v58, 0.0  ;;  %589 = vst.msk [vmem:[#allocation2] sm:$0x1] %vm588_vm2, %v867_v52 }
 0x137   :  { %v605_v3 = vadd.f32 %v582_v14, %v544_v62 }
 0x138   :  { %v617_v38 = vadd.f32 %v616_v59, %v602_v24  ;;  %v606_v27 = vadd.f32 %v583_v35, %v545_v29 }
 0x13a   :  { %v618_v0 = vadd.f32 %v617_v38, %v603_v60 }
 0x13c   :  { %v619_v40 = vadd.f32 %v618_v0, %v604_v63 }
 0x13d   :  { %v590_v10 = vld [vmem:[#allocation2] sm:$0x1] }
 0x13e   :  { %v620_v4 = vadd.f32 %v619_v40, %v605_v3 }
 0x140   :  { %v621_v5 = vadd.f32 %v620_v4, %v606_v27 }
 0x142   :  { %622 = vadd.xlane.f32.xlu0 %v621_v5 }
 0x1cf   :  { %v623_v34 = vpop.xlane.xlu0 %622 }
 0x1d0   :  { %v624_v6 = vrot.slane %v623_v34, 4 }
 0x1d2   :  { %v625_v7 = vadd.f32 %v624_v6, %v623_v34 }
 0x1d4   :  { %v626_v25 = vrot.slane %v625_v7, 2 }
 0x1d6   :  { %v627_v2 = vadd.f32 %v626_v25, %v625_v7 }
 0x1d8   :  { %v628_v30 = vrot.slane %v627_v2, 1 }
 0x1da   :  { %v629_v9 = vadd.f32 %v628_v30, %v627_v2 }
 0x1dc   :  { %835 = vpush %v629_v9 }
 0x20d   :  { %s836_s27 = spop %835 }
 0x20e   :  { %v631_v11 = vstv %s836_s27 }
 0x20f   :  { %v632_v12 = vadd.f32 %v631_v11, %v590_v10 }
 0x211   :  { %634 = vst.msk [vmem:[#allocation2] sm:$0x1] %vm588_vm2, %v632_v12 }
 0x212   :  { %853 = shalt.err (!%p850_p4)
}
 0x213   :  { %s854_s8 = scalar_lea.hbm %s1304_s6, 16 }
 0x214   :  { %p855_p5 = scmp.ne.s32.totalorder %s1304_s6, %s854_s8  ;;  %p858_p6 = scmp.lt.u32.totalorder %s854_s8, %s1304_s6 }
 0x216   :  { %p860_p7 = pnand %p858_p6, %p855_p5 }
 0x218   :  { %863 = shalt.err (!%p860_p7)
}
 0x219   :  { %644 = dma.vmem_to_hbm [thread:$0]  %s642_s5, 16, %s1304_s6, [#allocation3]  }
 0x21a   :  { %864 = dma.done.wait [#allocation3], 16  }
 0x21b   :  { %865 = vsyncadd [#allocation3], 4294967280 }
 0x21c   :  { %648 = vsyncpa [#allocation3], 1 }

</bundles_post_ra>
